<compile_context>
chip_gen: v7x
topology: tpu7x:2x2x1
jax: 0.10.0
libtpu: 0.0.40
codegen_flags: <defaults>
</compile_context>

<pallas_src>
import jax
import jax.numpy as jnp
from jax.experimental import pallas as pl
from jax.experimental.pallas import tpu as pltpu

_LANES = 128      # vreg lane width
_SUBLANES = 8     # vreg sublane depth (f32)


def _diffeq_kernel(y_ref, ydd_ref):
    # Pure elementwise VPU work on full (block_rows, 128) tiles.
    y = y_ref[...]
    ydd_ref[...] = -(y * (1.0 + y * y))   # == -y - y**3


def diffeq_forward(t, states, *, block_rows=2048):
    """Pallas implementation of diffeq.forward(t, states).

    states: (N, 2) float32 with columns [y, yd].
    Returns (N, 2) float32 with columns [yd, -y - y**3].
    """
    del t  # t does not enter get_udot (matches reference semantics)
    n = states.shape[0]
    dtype = states.dtype

    y = states[:, 0]
    yd = states[:, 1]

    # Lane-dense layout: pad N up so it reshapes to (rows, 128) with rows a
    # multiple of both 8 (sublane tiling) and the block size (exact grid cover).
    rows = pl.cdiv(n, _LANES)
    rows = pl.cdiv(rows, _SUBLANES) * _SUBLANES
    br = min(block_rows, rows)            # block second-to-last dim, multiple of 8
    rows = pl.cdiv(rows, br) * br
    n_pad = rows * _LANES

    y_p = jnp.pad(y, (0, n_pad - n)) if n_pad != n else y
    y2 = y_p.reshape(rows, _LANES)

    spec = pl.BlockSpec((br, _LANES), lambda i: (i, 0))
    ydd2 = pl.pallas_call(
        _diffeq_kernel,
        out_shape=jax.ShapeDtypeStruct((rows, _LANES), dtype),
        grid=(rows // br,),
        in_specs=[spec],
        out_specs=spec,
        compiler_params=pltpu.CompilerParams(
            dimension_semantics=("parallel",),   # shards across TCs on v7x
            vmem_limit_bytes=32 * 1024 * 1024,   # explicit headroom (v7x-safe)
        ),
    )(y2)

    ydd = ydd2.reshape(-1)[:n]
    # out[:, 0] is a verbatim copy of states[:, 1]; reuse it directly instead of
    # writing it from the kernel (saves half the kernel's HBM write traffic).
    # TODO(synk): an ODE integrator that consumes [yd, ydd] could skip this
    # interleave entirely and keep the SoA layout end-to-end.
    return jnp.stack([yd, ydd], axis=1)


def _reference(states):
    y = states[:, 0]
    yd = states[:, 1]
    return jnp.stack([yd, -y - y ** 3], axis=1)


if __name__ == "__main__":
    key = jax.random.PRNGKey(0)

    # Small shape matching the module's expected input: states (N, 2).
    n = 8
    states = jax.random.normal(key, (n, 2), dtype=jnp.float32)
    t = jnp.float32(0.0)

    out = jax.block_until_ready(diffeq_forward(t, states))
    ref = _reference(states)
    assert out.shape == (n, 2)
    assert jnp.allclose(out, ref, atol=1e-6), "mismatch vs reference (n=8)"

    # Secondary check: non-aligned N with a small block to exercise the tiled
    # grid and padding path (grid > 1).
    key2 = jax.random.PRNGKey(1)
    n2 = 3000
    states2 = jax.random.normal(key2, (n2, 2), dtype=jnp.float32)
    out2 = jax.block_until_ready(diffeq_forward(t, states2, block_rows=8))
    ref2 = _reference(states2)
    assert out2.shape == (n2, 2)
    assert jnp.allclose(out2, ref2, atol=1e-5), "mismatch vs reference (n=3000)"

    print("KERNEL_OK")
</pallas_src>

<mosaic_0001>
module attributes {stable_mosaic.version = 11 : i64} {
  func.func @_diffeq_kernel(%arg0: i32, %arg1: memref<8x128xf32, #tpu.memory_space<vmem>>, %arg2: memref<8x128xf32, #tpu.memory_space<vmem>>) attributes {dimension_semantics = [#tpu.dimension_semantics<parallel>], iteration_bounds = array<i64: 1>, scalar_prefetch = 0 : i64, scratch_operands = 0 : i64, tpu.core_type = #tpu.core_type<tc>, window_params = [{transform_indices = @transform_0, window_bounds = array<i64: 8, 128>}, {transform_indices = @transform_1, window_bounds = array<i64: 8, 128>}]} {
    %c0 = arith.constant 0 : index
    %c0_0 = arith.constant 0 : index
    %0 = vector.load %arg1[%c0, %c0_0] : memref<8x128xf32, #tpu.memory_space<vmem>>, vector<8x128xf32>
    %1 = arith.mulf %0, %0 : vector<8x128xf32>
    %cst = arith.constant 1.000000e+00 : f32
    %2 = vector.broadcast %cst : f32 to vector<8x128xf32>
    %3 = arith.addf %2, %1 : vector<8x128xf32>
    %4 = arith.mulf %0, %3 : vector<8x128xf32>
    %cst_1 = arith.constant 0.000000e+00 : f32
    %5 = vector.broadcast %cst_1 : f32 to vector<8x128xf32>
    %6 = arith.subf %5, %4 : vector<8x128xf32>
    %c0_2 = arith.constant 0 : index
    %c0_3 = arith.constant 0 : index
    %7 = vector.load %arg2[%c0_2, %c0_3] : memref<8x128xf32, #tpu.memory_space<vmem>>, vector<8x128xf32>
    tpu.vector_store %arg2[%c0_2, %c0_3], %6 {strides = array<i32>} : memref<8x128xf32, #tpu.memory_space<vmem>>, vector<8x128xf32>,
    return
  }
  func.func @transform_0(%arg0: i32) -> (i32, i32) {
    %c0_i32 = arith.constant 0 : i32
    %c0_i32_0 = arith.constant 0 : i32
    return %arg0, %c0_i32 : i32, i32
  }
  func.func @transform_1(%arg0: i32) -> (i32, i32) {
    %c0_i32 = arith.constant 0 : i32
    %c0_i32_0 = arith.constant 0 : i32
    return %arg0, %c0_i32 : i32, i32
  }
}

</mosaic_0001>

<bundles_post_ra>
// kernel: tpu_custom_call.1
= control target key start
LH: loop header
LB: loop body
LE: loop exit
PB: predicated region body
PF: predicated region fallthrough
CT: control target
= control target key end

     0   :  { %6 = vsyncpa [#allocation3], 0  ;;  %s128_s0 = inlined_call_operand.hbm [shape: f32[8,128], index: 0, kind: input, shape index: {}]   ;;  %s129_s1 = inlined_call_operand.hbm [shape: f32[8,128], index: 1, kind: output, shape index: {}]  }
   0x1   :  { %7 = vsyncpa [#allocation4], 0  ;;  %s92_s6 = smov [#allocation2]   ;;  %s44_s10 = scalar_lea.hbm %s128_s0, 128 }
   0x2   :  { %s14_s7 = sshll.u32 %s92_s6, 4  ;;  %p45_p0 = scmp.ne.s32.totalorder %s128_s0, %s44_s10  ;;  %s15_s7 = int_to_ptr.vmem [resolvable:$true] %s14_s7 }
   0x3   :  { %p48_p1 = scmp.lt.u32.totalorder %s44_s10, %s128_s0 }
   0x5   :  { %p50_p2 = pnand %p48_p1, %p45_p0 }
   0x7   :  { %53 = shalt.err (!%p50_p2)
}
   0x8   :  { %s54_s15 = scalar_lea.vmem %s15_s7, 128  ;;  %p59_p4 = scmp.lt.s32.totalorder %s15_s7, %s15_s7 }
   0x9   :  { %p55_p3 = scmp.ne.s32.totalorder %s15_s7, %s54_s15  ;;  %p60_p5 = scmp.lt.s32.totalorder %s54_s15, %s54_s15 }
   0xb   :  { %p61_p6 = por %p60_p5, %p59_p4 }
   0xd   :  { %p62_p7 = pnand %p61_p6, %p55_p3 }
   0xf   :  { %65 = shalt.err (!%p62_p7)
}
  0x10   :  { %17 = dma.hbm_to_vmem [thread:$0]  %s128_s0, 128, %s15_s7, [#allocation3]  }
  0x11   :  { %88 = dma.done.wait [#allocation3], 128  }
  0x12   :  { %89 = vsyncadd [#allocation3], 4294967168  ;;  %v21_v0 = vld [vmem:[#allocation2] sm:$0xff]  ;;  %s93_s18 = smov [#allocation5]  }
  0x13   :  { %v22_v1 = vmul.f32 %v21_v0, %v21_v0  ;;  %s33_s19 = sshll.u32 %s93_s18, 4  ;;  %s34_s19 = int_to_ptr.vmem [resolvable:$true] %s33_s19 }
  0x14   :  { %s66_s20 = scalar_lea.vmem %s34_s19, 128  ;;  %p71_p9 = scmp.lt.s32.totalorder %s34_s19, %s34_s19 }
  0x15   :  { %v23_v2 = vadd.f32 1.0, %v22_v1  ;;  %p67_p8 = scmp.ne.s32.totalorder %s34_s19, %s66_s20  ;;  %p72_p10 = scmp.lt.s32.totalorder %s66_s20, %s66_s20 }
  0x17   :  { %v24_v3 = vmul.f32 %v23_v2, %v21_v0  ;;  %p73_p11 = por %p72_p10, %p71_p9 }
  0x19   :  { %v25_v4 = vsub.f32 0.0, %v24_v3  ;;  %p74_p12 = pnand %p73_p11, %p67_p8 }
  0x1b   :  { %26 = vst [vmem:[#allocation5] sm:$0xff] %v25_v4 }
  0x1c   :  { %77 = shalt.err (!%p74_p12)
}
  0x1d   :  { %s78_s22 = scalar_lea.hbm %s129_s1, 128 }
  0x1e   :  { %p79_p13 = scmp.ne.s32.totalorder %s129_s1, %s78_s22  ;;  %p82_p0 = scmp.lt.u32.totalorder %s78_s22, %s129_s1 }
  0x20   :  { %p84_p1 = pnand %p82_p0, %p79_p13 }
  0x22   :  { %87 = shalt.err (!%p84_p1)
}
  0x23   :  { %36 = dma.vmem_to_hbm [thread:$0]  %s34_s19, 128, %s129_s1, [#allocation4]  }
  0x24   :  { %90 = dma.done.wait [#allocation4], 128  }
  0x25   :  { %91 = vsyncadd [#allocation4], 4294967168 }
  0x26   :  { %40 = vsyncpa [#allocation3], 1 }
  0x27   :  { %41 = vsyncpa [#allocation4], 1 }

</bundles_post_ra>
